<compile_context>
chip_gen: v7x
topology: tpu7x:2x2x1
jax: 0.10.0
libtpu: 0.0.40
codegen_flags: <defaults>
</compile_context>

<pallas_src>
import functools

import jax
import jax.numpy as jnp
from jax import lax
from jax.experimental import pallas as pl
from jax.experimental.pallas import tpu as pltpu

OUT_W = 128          # lane-dense output slab width
C_ACT, C_LOGP, C_VAL, C_ENT = 0, 1, 2, 8   # slab column layout (hidden follows entropy)


def _a2c_rollout_kernel(state_ref, u_ref, h0_ref,
                        w_enc_ref, w_gx_ref, w_gh_ref, w_head_ref,
                        bias_ref, tri_ref,
                        out_ref, h_scr,
                        *, hidden, n_actions, ent_off, hid_off):
    H, A = hidden, n_actions
    t = pl.program_id(1)

    # carry the recurrent state in VMEM scratch across the (arbitrary) time axis
    @pl.when(t == 0)
    def _():
        h_scr[...] = h0_ref[...]

    state = state_ref[...]          # (TB, D)
    u = u_ref[...]                  # (TB, 1)
    h = h_scr[...]                  # (TB, H)
    bias = bias_ref[...]            # (8, BW)  -- loaded once per step, sliced below

    # ---- encoder: Linear + ReLU ----
    x = jnp.dot(state, w_enc_ref[...], preferred_element_type=jnp.float32) \
        + bias[0:1, :H]
    x = jnp.maximum(x, 0.0)

    # ---- GRU cell (torch.nn.GRUCell semantics); three independent (H,H) gate
    #      matmuls per path so no sub-128-lane slicing of matmul results ----
    gxr = jnp.dot(x, w_gx_ref[0], preferred_element_type=jnp.float32) + bias[1:2, :H]
    gxz = jnp.dot(x, w_gx_ref[1], preferred_element_type=jnp.float32) + bias[2:3, :H]
    gxn = jnp.dot(x, w_gx_ref[2], preferred_element_type=jnp.float32) + bias[3:4, :H]
    ghr = jnp.dot(h, w_gh_ref[0], preferred_element_type=jnp.float32) + bias[4:5, :H]
    ghz = jnp.dot(h, w_gh_ref[1], preferred_element_type=jnp.float32) + bias[5:6, :H]
    ghn = jnp.dot(h, w_gh_ref[2], preferred_element_type=jnp.float32) + bias[6:7, :H]

    r = jax.nn.sigmoid(gxr + ghr)
    z = jax.nn.sigmoid(gxz + ghz)
    n = jnp.tanh(gxn + r * ghn)
    h_new = (1.0 - z) * n + z * h

    # ---- fused policy + value head: one lane-dense matmul, split afterwards ----
    lv = jnp.dot(h_new, w_head_ref[...], preferred_element_type=jnp.float32) \
        + bias[7:8, :A + 1]
    logits = lv[:, :A]
    value = lv[:, A:A + 1]

    # ---- softmax over action dim (exact division: keeps sampled action bit-stable) ----
    m = jnp.max(logits, axis=-1, keepdims=True)
    e = jnp.exp(logits - m)
    s = jnp.sum(e, axis=-1, keepdims=True)
    probs = e / s
    log_probs = (logits - m) - jnp.log(s)

    # ---- categorical sample via inverse CDF (tri is a resident constant input) ----
    cdf = jnp.dot(probs, tri_ref[...], preferred_element_type=jnp.float32)
    action = jnp.sum((cdf < u).astype(jnp.int32), axis=-1, keepdims=True)
    action = jnp.minimum(action, A - 1)            # guard against fp round-off

    # log_prob of the sampled action (gather via one-hot)
    act_col = lax.broadcasted_iota(jnp.int32, probs.shape, 1)
    onehot = (act_col == action).astype(jnp.float32)
    logp = jnp.sum(onehot * log_probs, axis=-1, keepdims=True)

    # elementwise entropy term: reuse log-softmax (no extra log, no 0*-inf NaN)
    entropy = -probs * log_probs

    h_scr[...] = h_new

    # ---- pack everything into one lane-dense (TB, 128) output slab ----
    out_ref[:, C_ACT:C_ACT + 1] = action.astype(jnp.float32)
    out_ref[:, C_LOGP:C_LOGP + 1] = logp
    out_ref[:, C_VAL:C_VAL + 1] = value
    out_ref[:, ent_off:ent_off + A] = entropy
    out_ref[:, hid_off:hid_off + H] = h_new


def _pack_params(params, H, A):
    """Consolidate the 10 weight/bias tensors into 5 resident arrays."""
    w_x, w_h = params["w_x"], params["w_h"]
    w_gx = jnp.stack([w_x[:, :H], w_x[:, H:2 * H], w_x[:, 2 * H:]], axis=0)    # (3,H,H)
    w_gh = jnp.stack([w_h[:, :H], w_h[:, H:2 * H], w_h[:, 2 * H:]], axis=0)    # (3,H,H)
    w_head = jnp.concatenate([params["w_pi"], params["w_v"]], axis=1)          # (H,A+1)

    BW = max(H, A + 1)

    def row(v):
        v = v.reshape(-1)
        return jnp.pad(v, (0, BW - v.shape[0]))

    b_x = params["b_x"].reshape(-1)
    b_h = params["b_h"].reshape(-1)
    b_head = jnp.concatenate([params["b_pi"].reshape(-1), params["b_v"].reshape(-1)])
    bias = jnp.stack([row(params["b_enc"]),
                      row(b_x[:H]), row(b_x[H:2 * H]), row(b_x[2 * H:]),
                      row(b_h[:H]), row(b_h[H:2 * H]), row(b_h[2 * H:]),
                      row(b_head)], axis=0)                                    # (8,BW)

    tri = (jnp.arange(A)[:, None] <= jnp.arange(A)[None, :]).astype(jnp.float32)
    return w_gx, w_gh, w_head, bias, tri


def a2c_rollout(states, gru_hidx, u, params):
    """Run T recurrent forward steps in one kernel.

    states: (T, B, D) f32, gru_hidx: (B, H) f32, u: (T, B, 1) uniform f32.
    Returns per-step (action (T,B) i32, log_prob (T,B), value (T,B,1),
    entropy (T,B,A), gru_hidden (T,B,H)).
    """
    T, B, D = states.shape
    H = gru_hidx.shape[1]
    A = params["w_pi"].shape[1]

    ent_off = C_ENT
    hid_off = C_ENT + A
    assert hid_off + H <= OUT_W, "output slab layout overflow"

    w_gx, w_gh, w_head, bias, tri = _pack_params(params, H, A)

    TB = 8 if B % 8 == 0 else B          # batch block (sublane-aligned)
    nb = B // TB

    kernel = functools.partial(_a2c_rollout_kernel, hidden=H, n_actions=A,
                               ent_off=ent_off, hid_off=hid_off)

    grid_spec = pltpu.PrefetchScalarGridSpec(
        num_scalar_prefetch=0,
        grid=(nb, T),
        in_specs=[
            pl.BlockSpec((None, TB, D), lambda bi, t: (t, bi, 0)),   # state_t
            pl.BlockSpec((None, TB, 1), lambda bi, t: (t, bi, 0)),   # u_t
            pl.BlockSpec((TB, H), lambda bi, t: (bi, 0)),            # h0 (copied once / bi)
            # weights: constant block index -> DMA'd once, VMEM-resident for all (bi, t)
            pl.BlockSpec(params["w_enc"].shape, lambda bi, t: (0, 0)),
            pl.BlockSpec(w_gx.shape, lambda bi, t: (0, 0, 0)),
            pl.BlockSpec(w_gh.shape, lambda bi, t: (0, 0, 0)),
            pl.BlockSpec(w_head.shape, lambda bi, t: (0, 0)),
            pl.BlockSpec(bias.shape, lambda bi, t: (0, 0)),
            pl.BlockSpec(tri.shape, lambda bi, t: (0, 0)),
        ],
        out_specs=pl.BlockSpec((None, TB, OUT_W), lambda bi, t: (t, bi, 0)),
        scratch_shapes=[pltpu.VMEM((TB, H), jnp.float32)],
    )

    slab = pl.pallas_call(
        kernel,
        out_shape=jax.ShapeDtypeStruct((T, B, OUT_W), jnp.float32),
        grid_spec=grid_spec,
        compiler_params=pltpu.CompilerParams(
            dimension_semantics=("parallel", "arbitrary")),
    )(states, u, gru_hidx, params["w_enc"], w_gx, w_gh, w_head, bias, tri)

    action = slab[:, :, C_ACT].astype(jnp.int32)
    log_prob = slab[:, :, C_LOGP]
    value = slab[:, :, C_VAL:C_VAL + 1]
    entropy = slab[:, :, ent_off:ent_off + A]
    gru_hidden = slab[:, :, hid_off:hid_off + H]
    return action, log_prob, value, entropy, gru_hidden
    # NOTE: at scale (H >= 128), cast MXU operands to bf16 (keep f32 accumulation and
    # f32 sigmoid/tanh/exp), fuse the three gate matmuls per path into a single
    # (H, 3H) matmul (slices then land on 128-lane boundaries), and re-budget
    # weight residency for v7x's 64 MiB VMEM.


def a2c_forward(state, gru_hidx, u, params):
    """Single-step forward matching A2C.forward: state (B,D), gru_hidx (B,H), u (B,1)."""
    a, lp, v, ent, h = a2c_rollout(state[None], gru_hidx, u[None], params)
    return a[0], lp[0], v[0], ent[0], h[0]


def _reference_forward(state, h, u, p):
    """Pure-JAX reference of one forward step (for correctness check)."""
    H = h.shape[1]
    x = jnp.maximum(state @ p["w_enc"] + p["b_enc"], 0.0)
    gx = x @ p["w_x"] + p["b_x"]
    gh = h @ p["w_h"] + p["b_h"]
    r = jax.nn.sigmoid(gx[:, :H] + gh[:, :H])
    z = jax.nn.sigmoid(gx[:, H:2 * H] + gh[:, H:2 * H])
    n = jnp.tanh(gx[:, 2 * H:] + r * gh[:, 2 * H:])
    h_new = (1.0 - z) * n + z * h
    logits = h_new @ p["w_pi"] + p["b_pi"]
    value = h_new @ p["w_v"] + p["b_v"]
    probs = jax.nn.softmax(logits, axis=1)
    log_probs = jax.nn.log_softmax(logits, axis=1)
    cdf = jnp.cumsum(probs, axis=1)
    action = jnp.minimum(jnp.sum((cdf < u).astype(jnp.int32), axis=1),
                         probs.shape[1] - 1)
    logp = jnp.take_along_axis(log_probs, action[:, None], axis=1)[:, 0]
    entropy = -probs * log_probs
    return action, logp, value, entropy, h_new


def _reference_rollout(states, h0, u, p):
    outs, h = [], h0
    for t in range(states.shape[0]):
        a, lp, v, ent, h = _reference_forward(states[t], h, u[t], p)
        outs.append((a, lp, v, ent, h))
    stack = lambda i: jnp.stack([o[i] for o in outs], axis=0)
    return stack(0), stack(1), stack(2), stack(3), stack(4)


def make_params(key, obs_dim, hidden, n_actions):
    ks = jax.random.split(key, 7)
    sc = 0.1
    return {
        "w_enc": sc * jax.random.normal(ks[0], (obs_dim, hidden), jnp.float32),
        "b_enc": jnp.zeros((1, hidden), jnp.float32),
        "w_x":   sc * jax.random.normal(ks[1], (hidden, 3 * hidden), jnp.float32),
        "b_x":   jnp.zeros((1, 3 * hidden), jnp.float32),
        "w_h":   sc * jax.random.normal(ks[2], (hidden, 3 * hidden), jnp.float32),
        "b_h":   jnp.zeros((1, 3 * hidden), jnp.float32),
        "w_pi":  sc * jax.random.normal(ks[3], (hidden, n_actions), jnp.float32),
        "b_pi":  jnp.zeros((1, n_actions), jnp.float32),
        "w_v":   sc * jax.random.normal(ks[4], (hidden, 1), jnp.float32),
        "b_v":   jnp.zeros((1, 1), jnp.float32),
    }


if __name__ == "__main__":
    T, B, D, H, A = 4, 8, 16, 32, 8   # n_step, nenv, obs_dim, hidden_size, n_actions

    key = jax.random.PRNGKey(0)
    k_state, k_hid, k_u, k_params = jax.random.split(key, 4)

    states = jax.random.normal(k_state, (T, B, D), jnp.float32)
    gru_hidx = jax.random.normal(k_hid, (B, H), jnp.float32)
    u = jax.random.uniform(k_u, (T, B, 1), jnp.float32)   # categorical sampling noise
    params = make_params(k_params, D, H, A)

    # --- time-folded rollout kernel (T forward steps, weights VMEM-resident) ---
    action, log_prob, value, entropy, gru_hidden = jax.block_until_ready(
        a2c_rollout(states, gru_hidx, u, params))

    a_ref, lp_ref, v_ref, ent_ref, h_ref = _reference_rollout(states, gru_hidx, u, params)
    assert (action == a_ref).all()
    assert jnp.allclose(log_prob, lp_ref, atol=2e-2)
    assert jnp.allclose(value, v_ref, atol=2e-2)
    assert jnp.allclose(entropy, ent_ref, atol=2e-2)
    assert jnp.allclose(gru_hidden, h_ref, atol=2e-2)

    # --- single-step forward (module's A2C.forward signature) ---
    a1, lp1, v1, e1, h1 = jax.block_until_ready(
        a2c_forward(states[0], gru_hidx, u[0], params))
    a_r, lp_r, v_r, e_r, h_r = _reference_forward(states[0], gru_hidx, u[0], params)
    assert (a1 == a_r).all()
    assert jnp.allclose(lp1, lp_r, atol=2e-2)
    assert jnp.allclose(v1, v_r, atol=2e-2)
    assert jnp.allclose(e1, e_r, atol=2e-2)
    assert jnp.allclose(h1, h_r, atol=2e-2)

    # TODO(synk): calculate_gae / parameter_update / learn are training-loop code
    # (optimizer + environment stepping), not part of the forward pass; not kernelized.
    print("KERNEL_OK")
</pallas_src>

<mosaic_0001>
module attributes {stable_mosaic.version = 11 : i64} {
  func.func @_a2c_rollout_kernel(%arg0: i32, %arg1: i32, %arg2: memref<1x8x16xf32, #tpu.memory_space<vmem>>, %arg3: memref<1x8x1xf32, #tpu.memory_space<vmem>>, %arg4: memref<8x32xf32, #tpu.memory_space<vmem>>, %arg5: memref<16x32xf32, #tpu.memory_space<vmem>>, %arg6: memref<3x32x32xf32, #tpu.memory_space<vmem>>, %arg7: memref<3x32x32xf32, #tpu.memory_space<vmem>>, %arg8: memref<32x9xf32, #tpu.memory_space<vmem>>, %arg9: memref<8x32xf32, #tpu.memory_space<vmem>>, %arg10: memref<8x8xf32, #tpu.memory_space<vmem>>, %arg11: memref<1x8x128xf32, #tpu.memory_space<vmem>>, %arg12: memref<8x32xf32, #tpu.memory_space<vmem>>) attributes {dimension_semantics = [#tpu.dimension_semantics<parallel>, #tpu.dimension_semantics<arbitrary>], iteration_bounds = array<i64: 1, 4>, scalar_prefetch = 0 : i64, scratch_operands = 1 : i64, tpu.core_type = #tpu.core_type<tc>, window_params = [{transform_indices = @transform_0, window_bounds = array<i64: 1, 8, 16>}, {transform_indices = @transform_1, window_bounds = array<i64: 1, 8, 1>}, {transform_indices = @transform_2, window_bounds = array<i64: 8, 32>}, {pipeline_mode = #tpu.pipeline_mode<synchronous>, transform_indices = @transform_3, window_bounds = array<i64: 16, 32>}, {pipeline_mode = #tpu.pipeline_mode<synchronous>, transform_indices = @transform_4, window_bounds = array<i64: 3, 32, 32>}, {pipeline_mode = #tpu.pipeline_mode<synchronous>, transform_indices = @transform_5, window_bounds = array<i64: 3, 32, 32>}, {pipeline_mode = #tpu.pipeline_mode<synchronous>, transform_indices = @transform_6, window_bounds = array<i64: 32, 9>}, {pipeline_mode = #tpu.pipeline_mode<synchronous>, transform_indices = @transform_7, window_bounds = array<i64: 8, 32>}, {pipeline_mode = #tpu.pipeline_mode<synchronous>, transform_indices = @transform_8, window_bounds = array<i64: 8, 8>}, {transform_indices = @transform_9, window_bounds = array<i64: 1, 8, 128>}]} {
    %c0_i32 = arith.constant 0 : i32
    %0 = arith.cmpi eq, %arg1, %c0_i32 : i32
    %1 = arith.extui %0 : i1 to i32
    %c0_i32_0 = arith.constant 0 : i32
    %2 = arith.cmpi ne, %1, %c0_i32_0 : i32
    scf.if %2 {
      %c0_64 = arith.constant 0 : index
      %c0_65 = arith.constant 0 : index
      %130 = vector.load %arg4[%c0_64, %c0_65] : memref<8x32xf32, #tpu.memory_space<vmem>>, vector<8x32xf32>
      %c0_66 = arith.constant 0 : index
      %c0_67 = arith.constant 0 : index
      %131 = vector.load %arg12[%c0_66, %c0_67] : memref<8x32xf32, #tpu.memory_space<vmem>>, vector<8x32xf32>
      tpu.vector_store %arg12[%c0_66, %c0_67], %130 {strides = array<i32>} : memref<8x32xf32, #tpu.memory_space<vmem>>, vector<8x32xf32>,
    } else {
    }
    %c0 = arith.constant 0 : index
    %c0_1 = arith.constant 0 : index
    %c0_2 = arith.constant 0 : index
    %3 = vector.load %arg2[%c0, %c0_1, %c0_2] : memref<1x8x16xf32, #tpu.memory_space<vmem>>, vector<1x8x16xf32>
    %4 = vector.shape_cast %3 : vector<1x8x16xf32> to vector<8x16xf32>
    %c0_3 = arith.constant 0 : index
    %c0_4 = arith.constant 0 : index
    %c0_5 = arith.constant 0 : index
    %5 = vector.load %arg3[%c0_3, %c0_4, %c0_5] : memref<1x8x1xf32, #tpu.memory_space<vmem>>, vector<1x8x1xf32>
    %6 = vector.shape_cast %5 : vector<1x8x1xf32> to vector<8x1xf32>
    %c0_6 = arith.constant 0 : index
    %c0_7 = arith.constant 0 : index
    %7 = vector.load %arg12[%c0_6, %c0_7] : memref<8x32xf32, #tpu.memory_space<vmem>>, vector<8x32xf32>
    %c0_8 = arith.constant 0 : index
    %c0_9 = arith.constant 0 : index
    %8 = vector.load %arg9[%c0_8, %c0_9] : memref<8x32xf32, #tpu.memory_space<vmem>>, vector<8x32xf32>
    %c0_10 = arith.constant 0 : index
    %c0_11 = arith.constant 0 : index
    %9 = vector.load %arg5[%c0_10, %c0_11] : memref<16x32xf32, #tpu.memory_space<vmem>>, vector<16x32xf32>
    %cst = arith.constant dense<0.000000e+00> : vector<8x32xf32>
    %10 = tpu.matmul %4, %9, %cst {dimension_numbers = #tpu.dot_dimension_numbers<[1], [0], [0], [1], [0, 0, 1, 1], [], []>} : vector<8x16xf32>, vector<16x32xf32>, vector<8x32xf32> -> vector<8x32xf32>
    %11 = vector.extract_strided_slice %8 {offsets = [0, 0], sizes = [1, 32], strides = [1, 1]} : vector<8x32xf32> to vector<1x32xf32>
    %12 = vector.broadcast %11 : vector<1x32xf32> to vector<8x32xf32>
    %13 = arith.addf %10, %12 : vector<8x32xf32>
    %cst_12 = arith.constant 0.000000e+00 : f32
    %14 = vector.broadcast %cst_12 : f32 to vector<8x32xf32>
    %15 = arith.maximumf %13, %14 : vector<8x32xf32>
    %c0_13 = arith.constant 0 : index
    %c0_14 = arith.constant 0 : index
    %c0_15 = arith.constant 0 : index
    %16 = vector.load %arg6[%c0_13, %c0_14, %c0_15] : memref<3x32x32xf32, #tpu.memory_space<vmem>>, vector<1x32x32xf32>
    %17 = vector.shape_cast %16 : vector<1x32x32xf32> to vector<32x32xf32>
    %cst_16 = arith.constant dense<0.000000e+00> : vector<8x32xf32>
    %18 = tpu.matmul %15, %17, %cst_16 {dimension_numbers = #tpu.dot_dimension_numbers<[1], [0], [0], [1], [0, 0, 1, 1], [], []>} : vector<8x32xf32>, vector<32x32xf32>, vector<8x32xf32> -> vector<8x32xf32>
    %19 = vector.extract_strided_slice %8 {offsets = [1, 0], sizes = [1, 32], strides = [1, 1]} : vector<8x32xf32> to vector<1x32xf32>
    %20 = vector.broadcast %19 : vector<1x32xf32> to vector<8x32xf32>
    %21 = arith.addf %18, %20 : vector<8x32xf32>
    %c1 = arith.constant 1 : index
    %c0_17 = arith.constant 0 : index
    %c0_18 = arith.constant 0 : index
    %22 = vector.load %arg6[%c1, %c0_17, %c0_18] : memref<3x32x32xf32, #tpu.memory_space<vmem>>, vector<1x32x32xf32>
    %23 = vector.shape_cast %22 : vector<1x32x32xf32> to vector<32x32xf32>
    %cst_19 = arith.constant dense<0.000000e+00> : vector<8x32xf32>
    %24 = tpu.matmul %15, %23, %cst_19 {dimension_numbers = #tpu.dot_dimension_numbers<[1], [0], [0], [1], [0, 0, 1, 1], [], []>} : vector<8x32xf32>, vector<32x32xf32>, vector<8x32xf32> -> vector<8x32xf32>
    %25 = vector.extract_strided_slice %8 {offsets = [2, 0], sizes = [1, 32], strides = [1, 1]} : vector<8x32xf32> to vector<1x32xf32>
    %26 = vector.broadcast %25 : vector<1x32xf32> to vector<8x32xf32>
    %27 = arith.addf %24, %26 : vector<8x32xf32>
    %c2 = arith.constant 2 : index
    %c0_20 = arith.constant 0 : index
    %c0_21 = arith.constant 0 : index
    %28 = vector.load %arg6[%c2, %c0_20, %c0_21] : memref<3x32x32xf32, #tpu.memory_space<vmem>>, vector<1x32x32xf32>
    %29 = vector.shape_cast %28 : vector<1x32x32xf32> to vector<32x32xf32>
    %cst_22 = arith.constant dense<0.000000e+00> : vector<8x32xf32>
    %30 = tpu.matmul %15, %29, %cst_22 {dimension_numbers = #tpu.dot_dimension_numbers<[1], [0], [0], [1], [0, 0, 1, 1], [], []>} : vector<8x32xf32>, vector<32x32xf32>, vector<8x32xf32> -> vector<8x32xf32>
    %31 = vector.extract_strided_slice %8 {offsets = [3, 0], sizes = [1, 32], strides = [1, 1]} : vector<8x32xf32> to vector<1x32xf32>
    %32 = vector.broadcast %31 : vector<1x32xf32> to vector<8x32xf32>
    %33 = arith.addf %30, %32 : vector<8x32xf32>
    %c0_23 = arith.constant 0 : index
    %c0_24 = arith.constant 0 : index
    %c0_25 = arith.constant 0 : index
    %34 = vector.load %arg7[%c0_23, %c0_24, %c0_25] : memref<3x32x32xf32, #tpu.memory_space<vmem>>, vector<1x32x32xf32>
    %35 = vector.shape_cast %34 : vector<1x32x32xf32> to vector<32x32xf32>
    %cst_26 = arith.constant dense<0.000000e+00> : vector<8x32xf32>
    %36 = tpu.matmul %7, %35, %cst_26 {dimension_numbers = #tpu.dot_dimension_numbers<[1], [0], [0], [1], [0, 0, 1, 1], [], []>} : vector<8x32xf32>, vector<32x32xf32>, vector<8x32xf32> -> vector<8x32xf32>
    %37 = vector.extract_strided_slice %8 {offsets = [4, 0], sizes = [1, 32], strides = [1, 1]} : vector<8x32xf32> to vector<1x32xf32>
    %38 = vector.broadcast %37 : vector<1x32xf32> to vector<8x32xf32>
    %39 = arith.addf %36, %38 : vector<8x32xf32>
    %c1_27 = arith.constant 1 : index
    %c0_28 = arith.constant 0 : index
    %c0_29 = arith.constant 0 : index
    %40 = vector.load %arg7[%c1_27, %c0_28, %c0_29] : memref<3x32x32xf32, #tpu.memory_space<vmem>>, vector<1x32x32xf32>
    %41 = vector.shape_cast %40 : vector<1x32x32xf32> to vector<32x32xf32>
    %cst_30 = arith.constant dense<0.000000e+00> : vector<8x32xf32>
    %42 = tpu.matmul %7, %41, %cst_30 {dimension_numbers = #tpu.dot_dimension_numbers<[1], [0], [0], [1], [0, 0, 1, 1], [], []>} : vector<8x32xf32>, vector<32x32xf32>, vector<8x32xf32> -> vector<8x32xf32>
    %43 = vector.extract_strided_slice %8 {offsets = [5, 0], sizes = [1, 32], strides = [1, 1]} : vector<8x32xf32> to vector<1x32xf32>
    %44 = vector.broadcast %43 : vector<1x32xf32> to vector<8x32xf32>
    %45 = arith.addf %42, %44 : vector<8x32xf32>
    %c2_31 = arith.constant 2 : index
    %c0_32 = arith.constant 0 : index
    %c0_33 = arith.constant 0 : index
    %46 = vector.load %arg7[%c2_31, %c0_32, %c0_33] : memref<3x32x32xf32, #tpu.memory_space<vmem>>, vector<1x32x32xf32>
    %47 = vector.shape_cast %46 : vector<1x32x32xf32> to vector<32x32xf32>
    %cst_34 = arith.constant dense<0.000000e+00> : vector<8x32xf32>
    %48 = tpu.matmul %7, %47, %cst_34 {dimension_numbers = #tpu.dot_dimension_numbers<[1], [0], [0], [1], [0, 0, 1, 1], [], []>} : vector<8x32xf32>, vector<32x32xf32>, vector<8x32xf32> -> vector<8x32xf32>
    %49 = vector.extract_strided_slice %8 {offsets = [6, 0], sizes = [1, 32], strides = [1, 1]} : vector<8x32xf32> to vector<1x32xf32>
    %50 = vector.broadcast %49 : vector<1x32xf32> to vector<8x32xf32>
    %51 = arith.addf %48, %50 : vector<8x32xf32>
    %52 = arith.addf %21, %39 : vector<8x32xf32>
    %53 = arith.negf %52 : vector<8x32xf32>
    %54 = math.exp %53 : vector<8x32xf32>
    %cst_35 = arith.constant 1.000000e+00 : f32
    %55 = vector.broadcast %cst_35 : f32 to vector<8x32xf32>
    %56 = arith.addf %55, %54 : vector<8x32xf32>
    %57 = arith.divf %55, %56 : vector<8x32xf32>
    %58 = arith.addf %27, %45 : vector<8x32xf32>
    %59 = arith.negf %58 : vector<8x32xf32>
    %60 = math.exp %59 : vector<8x32xf32>
    %cst_36 = arith.constant 1.000000e+00 : f32
    %61 = vector.broadcast %cst_36 : f32 to vector<8x32xf32>
    %62 = arith.addf %61, %60 : vector<8x32xf32>
    %63 = arith.divf %61, %62 : vector<8x32xf32>
    %64 = arith.mulf %57, %51 : vector<8x32xf32>
    %65 = arith.addf %33, %64 : vector<8x32xf32>
    %66 = math.tanh %65 : vector<8x32xf32>
    %cst_37 = arith.constant 1.000000e+00 : f32
    %67 = vector.broadcast %cst_37 : f32 to vector<8x32xf32>
    %68 = arith.subf %67, %63 : vector<8x32xf32>
    %69 = arith.mulf %68, %66 : vector<8x32xf32>
    %70 = arith.mulf %63, %7 : vector<8x32xf32>
    %71 = arith.addf %69, %70 : vector<8x32xf32>
    %c0_38 = arith.constant 0 : index
    %c0_39 = arith.constant 0 : index
    %72 = vector.load %arg8[%c0_38, %c0_39] : memref<32x9xf32, #tpu.memory_space<vmem>>, vector<32x9xf32>
    %cst_40 = arith.constant dense<0.000000e+00> : vector<8x9xf32>
    %73 = tpu.matmul %71, %72, %cst_40 {dimension_numbers = #tpu.dot_dimension_numbers<[1], [0], [0], [1], [0, 0, 1, 1], [], []>} : vector<8x32xf32>, vector<32x9xf32>, vector<8x9xf32> -> vector<8x9xf32>
    %74 = vector.extract_strided_slice %8 {offsets = [7, 0], sizes = [1, 9], strides = [1, 1]} : vector<8x32xf32> to vector<1x9xf32>
    %75 = vector.broadcast %74 : vector<1x9xf32> to vector<8x9xf32>
    %76 = arith.addf %73, %75 : vector<8x9xf32>
    %77 = vector.extract_strided_slice %76 {offsets = [0, 0], sizes = [8, 8], strides = [1, 1]} : vector<8x9xf32> to vector<8x8xf32>
    %78 = vector.extract_strided_slice %76 {offsets = [0, 8], sizes = [8, 1], strides = [1, 1]} : vector<8x9xf32> to vector<8x1xf32>
    %cst_41 = arith.constant dense<0xFF800000> : vector<8xf32>
    %79 = vector.multi_reduction <maximumf>, %77, %cst_41 [1] : vector<8x8xf32> to vector<8xf32>
    %80 = vector.shape_cast %79 : vector<8xf32> to vector<8x1xf32>
    %81 = vector.broadcast %80 : vector<8x1xf32> to vector<8x8xf32>
    %82 = arith.subf %77, %81 : vector<8x8xf32>
    %83 = math.exp %82 : vector<8x8xf32>
    %cst_42 = arith.constant dense<0.000000e+00> : vector<8xf32>
    %84 = vector.multi_reduction <add>, %83, %cst_42 [1] : vector<8x8xf32> to vector<8xf32>
    %85 = vector.shape_cast %84 : vector<8xf32> to vector<8x1xf32>
    %86 = vector.broadcast %85 : vector<8x1xf32> to vector<8x8xf32>
    %87 = arith.divf %83, %86 : vector<8x8xf32>
    %88 = vector.broadcast %80 : vector<8x1xf32> to vector<8x8xf32>
    %89 = arith.subf %77, %88 : vector<8x8xf32>
    %90 = math.log %85 : vector<8x1xf32>
    %91 = vector.broadcast %90 : vector<8x1xf32> to vector<8x8xf32>
    %92 = arith.subf %89, %91 : vector<8x8xf32>
    %c0_43 = arith.constant 0 : index
    %c0_44 = arith.constant 0 : index
    %93 = vector.load %arg10[%c0_43, %c0_44] : memref<8x8xf32, #tpu.memory_space<vmem>>, vector<8x8xf32>
    %cst_45 = arith.constant dense<0.000000e+00> : vector<8x8xf32>
    %94 = tpu.matmul %87, %93, %cst_45 {dimension_numbers = #tpu.dot_dimension_numbers<[1], [0], [0], [1], [0, 0, 1, 1], [], []>} : vector<8x8xf32>, vector<8x8xf32>, vector<8x8xf32> -> vector<8x8xf32>
    %95 = vector.broadcast %6 : vector<8x1xf32> to vector<8x8xf32>
    %96 = arith.cmpf olt, %94, %95 : vector<8x8xf32>
    %97 = arith.extui %96 : vector<8x8xi1> to vector<8x8xi32>
    %cst_46 = arith.constant dense<0> : vector<8xi32>
    %98 = vector.multi_reduction <add>, %97, %cst_46 [1] : vector<8x8xi32> to vector<8xi32>
    %99 = vector.shape_cast %98 : vector<8xi32> to vector<8x1xi32>
    %c7_i32 = arith.constant 7 : i32
    %100 = vector.broadcast %c7_i32 : i32 to vector<8x1xi32>
    %101 = arith.minsi %99, %100 : vector<8x1xi32>
    %102 = tpu.iota {dimensions = array<i32: 1>} : vector<8x8xi32>
    %103 = vector.broadcast %101 : vector<8x1xi32> to vector<8x8xi32>
    %104 = arith.cmpi eq, %102, %103 : vector<8x8xi32>
    %105 = arith.extui %104 : vector<8x8xi1> to vector<8x8xi32>
    %106 = arith.sitofp %105 : vector<8x8xi32> to vector<8x8xf32>
    %107 = arith.mulf %106, %92 : vector<8x8xf32>
    %cst_47 = arith.constant dense<0.000000e+00> : vector<8xf32>
    %108 = vector.multi_reduction <add>, %107, %cst_47 [1] : vector<8x8xf32> to vector<8xf32>
    %109 = vector.shape_cast %108 : vector<8xf32> to vector<8x1xf32>
    %cst_48 = arith.constant 0.000000e+00 : f32
    %110 = vector.broadcast %cst_48 : f32 to vector<8x8xf32>
    %111 = arith.subf %110, %87 : vector<8x8xf32>
    %112 = arith.mulf %111, %92 : vector<8x8xf32>
    %c0_49 = arith.constant 0 : index
    %c0_50 = arith.constant 0 : index
    %113 = vector.load %arg12[%c0_49, %c0_50] : memref<8x32xf32, #tpu.memory_space<vmem>>, vector<8x32xf32>
    tpu.vector_store %arg12[%c0_49, %c0_50], %71 {strides = array<i32>} : memref<8x32xf32, #tpu.memory_space<vmem>>, vector<8x32xf32>,
    %114 = arith.sitofp %101 : vector<8x1xi32> to vector<8x1xf32>
    %c0_51 = arith.constant 0 : index
    %c0_52 = arith.constant 0 : index
    %c0_53 = arith.constant 0 : index
    %115 = vector.load %arg11[%c0_51, %c0_52, %c0_53] : memref<1x8x128xf32, #tpu.memory_space<vmem>>, vector<1x8x1xf32>
    %116 = vector.shape_cast %115 : vector<1x8x1xf32> to vector<8x1xf32>
    %117 = vector.shape_cast %114 : vector<8x1xf32> to vector<1x8x1xf32>
    tpu.vector_store %arg11[%c0_51, %c0_52, %c0_53], %117 {strides = array<i32>} : memref<1x8x128xf32, #tpu.memory_space<vmem>>, vector<1x8x1xf32>,
    %c0_54 = arith.constant 0 : index
    %c0_55 = arith.constant 0 : index
    %c1_56 = arith.constant 1 : index
    %118 = vector.load %arg11[%c0_54, %c0_55, %c1_56] : memref<1x8x128xf32, #tpu.memory_space<vmem>>, vector<1x8x1xf32>
    %119 = vector.shape_cast %118 : vector<1x8x1xf32> to vector<8x1xf32>
    %120 = vector.shape_cast %109 : vector<8x1xf32> to vector<1x8x1xf32>
    tpu.vector_store %arg11[%c0_54, %c0_55, %c1_56], %120 {strides = array<i32>} : memref<1x8x128xf32, #tpu.memory_space<vmem>>, vector<1x8x1xf32>,
    %c0_57 = arith.constant 0 : index
    %c0_58 = arith.constant 0 : index
    %c2_59 = arith.constant 2 : index
    %121 = vector.load %arg11[%c0_57, %c0_58, %c2_59] : memref<1x8x128xf32, #tpu.memory_space<vmem>>, vector<1x8x1xf32>
    %122 = vector.shape_cast %121 : vector<1x8x1xf32> to vector<8x1xf32>
    %123 = vector.shape_cast %78 : vector<8x1xf32> to vector<1x8x1xf32>
    tpu.vector_store %arg11[%c0_57, %c0_58, %c2_59], %123 {strides = array<i32>} : memref<1x8x128xf32, #tpu.memory_space<vmem>>, vector<1x8x1xf32>,
    %c0_60 = arith.constant 0 : index
    %c0_61 = arith.constant 0 : index
    %c8 = arith.constant 8 : index
    %124 = vector.load %arg11[%c0_60, %c0_61, %c8] : memref<1x8x128xf32, #tpu.memory_space<vmem>>, vector<1x8x8xf32>
    %125 = vector.shape_cast %124 : vector<1x8x8xf32> to vector<8x8xf32>
    %126 = vector.shape_cast %112 : vector<8x8xf32> to vector<1x8x8xf32>
    tpu.vector_store %arg11[%c0_60, %c0_61, %c8], %126 {strides = array<i32>} : memref<1x8x128xf32, #tpu.memory_space<vmem>>, vector<1x8x8xf32>,
    %c0_62 = arith.constant 0 : index
    %c0_63 = arith.constant 0 : index
    %c16 = arith.constant 16 : index
    %127 = vector.load %arg11[%c0_62, %c0_63, %c16] : memref<1x8x128xf32, #tpu.memory_space<vmem>>, vector<1x8x32xf32>
    %128 = vector.shape_cast %127 : vector<1x8x32xf32> to vector<8x32xf32>
    %129 = vector.shape_cast %71 : vector<8x32xf32> to vector<1x8x32xf32>
    tpu.vector_store %arg11[%c0_62, %c0_63, %c16], %129 {strides = array<i32>} : memref<1x8x128xf32, #tpu.memory_space<vmem>>, vector<1x8x32xf32>,
    return
  }
  func.func @transform_0(%arg0: i32, %arg1: i32) -> (i32, i32, i32) {
    %c0_i32 = arith.constant 0 : i32
    %c0_i32_0 = arith.constant 0 : i32
    return %arg1, %arg0, %c0_i32 : i32, i32, i32
  }
  func.func @transform_1(%arg0: i32, %arg1: i32) -> (i32, i32, i32) {
    %c0_i32 = arith.constant 0 : i32
    %c0_i32_0 = arith.constant 0 : i32
    return %arg1, %arg0, %c0_i32 : i32, i32, i32
  }
  func.func @transform_2(%arg0: i32, %arg1: i32) -> (i32, i32) {
    %c0_i32 = arith.constant 0 : i32
    %c0_i32_0 = arith.constant 0 : i32
    return %arg0, %c0_i32 : i32, i32
  }
  func.func @transform_3(%arg0: i32, %arg1: i32) -> (i32, i32) {
    %c0_i32 = arith.constant 0 : i32
    %c0_i32_0 = arith.constant 0 : i32
    %c0_i32_1 = arith.constant 0 : i32
    return %c0_i32, %c0_i32_0 : i32, i32
  }
  func.func @transform_4(%arg0: i32, %arg1: i32) -> (i32, i32, i32) {
    %c0_i32 = arith.constant 0 : i32
    %c0_i32_0 = arith.constant 0 : i32
    %c0_i32_1 = arith.constant 0 : i32
    %c0_i32_2 = arith.constant 0 : i32
    return %c0_i32, %c0_i32_0, %c0_i32_1 : i32, i32, i32
  }
  func.func @transform_5(%arg0: i32, %arg1: i32) -> (i32, i32, i32) {
    %c0_i32 = arith.constant 0 : i32
    %c0_i32_0 = arith.constant 0 : i32
    %c0_i32_1 = arith.constant 0 : i32
    %c0_i32_2 = arith.constant 0 : i32
    return %c0_i32, %c0_i32_0, %c0_i32_1 : i32, i32, i32
  }
  func.func @transform_6(%arg0: i32, %arg1: i32) -> (i32, i32) {
    %c0_i32 = arith.constant 0 : i32
    %c0_i32_0 = arith.constant 0 : i32
    %c0_i32_1 = arith.constant 0 : i32
    return %c0_i32, %c0_i32_0 : i32, i32
  }
  func.func @transform_7(%arg0: i32, %arg1: i32) -> (i32, i32) {
    %c0_i32 = arith.constant 0 : i32
    %c0_i32_0 = arith.constant 0 : i32
    %c0_i32_1 = arith.constant 0 : i32
    return %c0_i32, %c0_i32_0 : i32, i32
  }
  func.func @transform_8(%arg0: i32, %arg1: i32) -> (i32, i32) {
    %c0_i32 = arith.constant 0 : i32
    %c0_i32_0 = arith.constant 0 : i32
    %c0_i32_1 = arith.constant 0 : i32
    return %c0_i32, %c0_i32_0 : i32, i32
  }
  func.func @transform_9(%arg0: i32, %arg1: i32) -> (i32, i32, i32) {
    %c0_i32 = arith.constant 0 : i32
    %c0_i32_0 = arith.constant 0 : i32
    return %arg1, %arg0, %c0_i32 : i32, i32, i32
  }
}

</mosaic_0001>

<bundles_post_ra>
// kernel: tpu_custom_call.1
= control target key start
LH: loop header
LB: loop body
LE: loop exit
PB: predicated region body
PF: predicated region fallthrough
CT: control target
= control target key end

     0   :  { %s2430_s0 = inlined_call_operand.hbm [shape: f32[4,8,16], index: 0, kind: input, shape index: {}]   ;;  %s2431_s1 = inlined_call_operand.vmem [shape: f32[4,8,1], index: 1, kind: input, shape index: {}]   ;;  %s2432_s2 = inlined_call_operand.hbm [shape: f32[8,32], index: 2, kind: input, shape index: {}]   ;;  %s2433_s3 = inlined_call_operand.hbm [shape: f32[16,32], index: 3, kind: input, shape index: {}]   ;;  %s2434_s4 = inlined_call_operand.vmem [shape: f32[3,32,32], index: 4, kind: input, shape index: {}]   ;;  %s2435_s5 = inlined_call_operand.hbm [shape: f32[3,32,32], index: 5, kind: input, shape index: {}]   ;;  %s2436_s6 = inlined_call_operand.vmem [shape: f32[32,9], index: 6, kind: input, shape index: {}]   ;;  %s2437_s7 = inlined_call_operand.vmem [shape: f32[8,32], index: 7, kind: input, shape index: {}]   ;;  %s2438_s8 = inlined_call_operand.vmem [shape: f32[8,8], index: 8, kind: input, shape index: {}]   ;;  %s2439_s9 = inlined_call_operand.hbm [shape: f32[4,8,128], index: 9, kind: output, shape index: {}]  }
   0x1   :  { %2447 = sst [smem:[#allocation18_spill]] %s2432_s2 }
   0x2   :  { %2448 = sst [smem:[#allocation19_spill]] %s2438_s8 }
   0x3   :  { %2449 = sst [smem:[#allocation20_spill]] %s2439_s9 }
   0x4   :  { %14 = vsyncpa [#allocation4], 0 }
   0x5   :  { %16 = vsyncpa [#allocation4 + $0x1], 0 }
   0x6   :  { %17 = vsyncpa [#allocation7], 0 }
   0x7   :  { %18 = vsyncpa [#allocation10], 0 }
   0x8   :  { %19 = vsyncpa [#allocation5], 0 }
   0x9   :  { %21 = vsyncpa [#allocation5 + $0x1], 0  ;;  %s2014_s30 = smov 0   ;;  %s2016_s10 = smov 0  }
   0xa   :  { %s2018_s11 = smov 0   ;;  %s2020_s12 = smov 0  }
   0xb   :  { %s2022_s13 = smov 0   ;;  %s2024_s14 = smov 0  }
   0xc LB: > { %2450 = sst [smem:[#allocation16_spill]] %s1928_s30  ;;  %s1401_s15 = sadd.s32 4294967295, %s1948_s14   ;;  %s1948_s14 = sphi %s2024_s14, %s27_s14   ;;  %s1944_s13 = sphi %s2022_s13, %s2475_s13   ;;  %s1940_s12 = sphi %s2020_s12, %s2474_s12   ;;  %s1936_s11 = sphi %s2018_s11, %s2473_s11   ;;  %s1932_s10 = sphi %s2016_s10, %s2472_s10   ;;  %s1928_s30 = sphi %s2014_s30, %s2471_s30  }
   0xd   : > { %s1402_s16 = sadd.s32 4294967294, %s1948_s14   ;;  %p61_p0 = scmp.ne.s32.totalorder %s1932_s10, %s1928_s30 }
   0xe   : > { %p2048_p1 = scmp.eq.s32.totalorder %s1401_s15, 0  ;;  %p2052_p2 = scmp.eq.s32.totalorder %s1401_s15, 3 }
   0xf   : > { %p273_p3 = scmp.eq.s32.totalorder %s1402_s16, 3  ;;  %p1403_p5 = scmp.ge.s32.totalorder %s1948_s14, 1 }
  0x10   : > { %s2451_s17 = scalar_select %p2048_p1, 1, 0 }
  0x11   : > { %s2452_s18 = scalar_select %p2052_p2, 1, 0 }
  0x12   : > { %p2058_p4 = por %p2048_p1, %p61_p0  ;;  %p2063_p6 = por %p273_p3, %p61_p0 }
  0x13   : > { %p280_p7 = scmp.lt.s32.totalorder %s1948_s14, 5  ;;  %s1950_s22 = smov [#allocation6]  }
  0x14   : > { %s2453_s19 = scalar_select %p2058_p4, 1, 0 }
  0x15   : > { %s2454_s20 = scalar_select %p2063_p6, 1, 0 }
  0x16   : > { %p2068_p8 = pnand %p1403_p5, %p280_p7  ;;  %s295_s23 = sshll.u32 %s1950_s22, 4  ;;  %s296_s23 = int_to_ptr.vmem [resolvable:$true] %s295_s23 }
  0x17   : > { %2455 = sst [smem:[#allocation17_spill]] %s2454_s20  ;;  %s1951_s24 = smov [#allocation8]  }
  0x18   : > { %s2456_s21 = scalar_select %p2068_p8, 1, 0 }
  0x19   : > { %p1640_p9 = pneg %p2068_p8  ;;  %s305_s25 = sshll.u32 %s1951_s24, 4  ;;  %s2080_s25 = int_to_ptr.vmem [resolvable:$true] %s305_s25 }
  0x1a   : > { %s1952_s27 = smov [#allocation9]   ;;  %s2458_s2 = sld [smem:[#allocation18_spill]] }
  0x1b   : > { %p2076_p10 = pnand %p1640_p9, %p2048_p1  ;;  %s2082_s28 = sshll.u32 %s1952_s27, 4  ;;  %s322_s28 = int_to_ptr.vmem [resolvable:$true] %s2082_s28 }
  0x1d   : > { %p2092_p12 = pneg %p2076_p10 }
  0x20   : > { %s1744_s16 = scalar_lea.hbm %s2458_s2, 128 }
  0x21   : > { %p1745_p11 = scmp.ne.s32.totalorder %s2458_s2, %s1744_s16  ;;  %p1751_p3 = scmp.lt.u32.totalorder %s1744_s16, %s2458_s2 }
  0x23   : > { %p1747_p13 = pnand %p2092_p12, %p1745_p11 }
  0x25   : > { %p1748_p0 = pneg %p1747_p13 }
  0x27   : > { %p1753_p5 = pnand %p1751_p3, %p1748_p0 }
  0x29   : > { %1756 = shalt.err (!%p1753_p5)
}
  0x2a   : > { %s1757_s29 = scalar_lea.vmem %s296_s23, 128  ;;  %p1765_p1 = scmp.lt.s32.totalorder %s296_s23, %s296_s23 }
  0x2b   : > { %p1758_p7 = scmp.ne.s32.totalorder %s296_s23, %s1757_s29  ;;  %p1766_p4 = scmp.lt.s32.totalorder %s1757_s29, %s1757_s29 }
  0x2d   : > { %p1760_p9 = pnand %p1758_p7, %p2092_p12  ;;  %p1767_p8 = por %p1766_p4, %p1765_p1 }
  0x2f   : > { %p1761_p6 = pneg %p1760_p9 }
  0x31   : > { %p1768_p2 = pnand %p1767_p8, %p1761_p6 }
  0x33   : > { %1771 = shalt.err (!%p1768_p2)
}
  0x34   : > { %1643 = dma.hbm_to_vmem [thread:$0]  (!%p2076_p10), %s2458_s2, 128, %s296_s23, [#allocation7]  }
  0x35   : > { %s1772_s22 = scalar_lea.hbm %s2433_s3, 256 }
  0x36   : > { %p1773_p11 = scmp.ne.s32.totalorder %s2433_s3, %s1772_s22  ;;  %p1779_p2 = scmp.lt.u32.totalorder %s1772_s22, %s2433_s3 }
  0x38   : > { %p1775_p13 = pnand %p1773_p11, %p2092_p12 }
  0x3a   : > { %p1776_p1 = pneg %p1775_p13 }
  0x3c   : > { %p1781_p4 = pnand %p1779_p2, %p1776_p1 }
  0x3e   : > { %1784 = shalt.err (!%p1781_p4)
}
  0x3f   : > { %s1785_s23 = scalar_lea.vmem %s2080_s25, 256  ;;  %p1793_p3 = scmp.lt.s32.totalorder %s2080_s25, %s2080_s25 }
  0x40   : > { %p1786_p6 = scmp.ne.s32.totalorder %s2080_s25, %s1785_s23  ;;  %p1794_p5 = scmp.lt.s32.totalorder %s1785_s23, %s1785_s23 }
  0x42   : > { %p1788_p8 = pnand %p1786_p6, %p2092_p12  ;;  %p1795_p7 = por %p1794_p5, %p1793_p3 }
  0x44   : > { %p1789_p0 = pneg %p1788_p8 }
  0x46   : > { %p1796_p9 = pnand %p1795_p7, %p1789_p0 }
  0x48   : > { %1799 = shalt.err (!%p1796_p9)
}
  0x49   : > { %s1953_s9 = smov 128   ;;  %s1954_s8 = smov 8  }
  0x4a   : > { %1646 = dma.hbm_to_vmem [thread:$0]  (!%p2076_p10), %s2433_s3, 256, %s2080_s25, [#allocation7], %s1953_s9, %s1953_s9, %s1954_s8  }
  0x4b   : > { %s1800_s22 = scalar_lea.hbm %s2435_s5, 1536 }
  0x4c   : > { %p1801_p11 = scmp.ne.s32.totalorder %s2435_s5, %s1800_s22  ;;  %p1807_p2 = scmp.lt.u32.totalorder %s1800_s22, %s2435_s5 }
  0x4e   : > { %p1803_p13 = pnand %p1801_p11, %p2092_p12 }
  0x50   : > { %p1804_p1 = pneg %p1803_p13 }
  0x52   : > { %p1809_p4 = pnand %p1807_p2, %p1804_p1 }
  0x54   : > { %1812 = shalt.err (!%p1809_p4)
}
  0x55   : > { %s1813_s20 = scalar_lea.vmem %s322_s28, 1536  ;;  %p1821_p3 = scmp.lt.s32.totalorder %s322_s28, %s322_s28 }
  0x56   : > { %p1814_p6 = scmp.ne.s32.totalorder %s322_s28, %s1813_s20  ;;  %p1822_p5 = scmp.lt.s32.totalorder %s1813_s20, %s1813_s20 }
  0x58   : > { %p1816_p8 = pnand %p1814_p6, %p2092_p12  ;;  %p1823_p7 = por %p1822_p5, %p1821_p3 }
  0x5a   : > { %p1817_p0 = pneg %p1816_p8 }
  0x5c   : > { %p1824_p9 = pnand %p1823_p7, %p1817_p0 }
  0x5e   : > { %1827 = shalt.err (!%p1824_p9)
}
  0x5f   : > { %1649 = dma.hbm_to_vmem [thread:$0]  (!%p2076_p10), %s2435_s5, 1536, %s322_s28, [#allocation10], %s1953_s9, %s1953_s9, %s1954_s8  }
  0x60   : > { %s48_s2 = sadd.s32 1, %s1936_s11  ;;  %s36_s24 = sadd.s32 1, %s1944_s13 }
  0x61   : > { %p55_p12 = scmp.ne.s32.totalorder %s1936_s11, %s1932_s10  ;;  %p37_p11 = scmp.ge.s32.totalorder %s36_s24, 4 }
  0x62   : > { %p56_p13 = scmp.eq.s32.totalorder %s1948_s14, 0  ;;  %p2460_p1 = scmp.ne.s32.totalorder %s2452_s18, 0 }
  0x63   : > { %p1661_p4 = scmp.lt.s32.totalorder %s1948_s14, 4  ;;  %s2477_s24 = smov (%p37_p11, %s36_s24), 0 }
  0x64   : > { %p2157_p2 = por %p2460_p1, %p55_p12  ;;  %p57_p6 = por %p56_p13, %p55_p12 }
  0x65   : > { %s344_s30 = sand.u32 1, %s1936_s11   ;;  %s43_s16 = ssub.s32 %s1944_s13, %s2477_s24 }
  0x66   : > { %p46_p8 = scmp.eq.s32.totalorder %s43_s16, 0  ;;  %s1408_s28 = sshll.u32 %s344_s30, 3 }
  0x67   : > { %s1409_s9 = sshll.u32 %s1944_s13, 7  ;;  %s348_s29 = scalar_lea.vmem [#allocation3], %s1408_s28 }
  0x68   : > { %s2169_s8 = scalar_select %p46_p8, %s1936_s11, %s48_s2  }
  0x69   : > { %s2174_s18 = scalar_lea.hbm %s2430_s0, %s1409_s9  ;;  %s356_s23 = sshll.u32 %s348_s29, 4  ;;  %s2176_s23 = int_to_ptr.vmem [resolvable:$true] %s356_s23 }
  0x6a   : > { %p2180_p10 = pnand %p1661_p4, %p57_p6  ;;  %s345_s25 = scalar_lea.sflag [#allocation4], %s344_s30 }
  0x6b   : > { %s1828_s15 = scalar_lea.hbm %s2174_s18, 128  ;;  %s1833_s28 = scalar_lea.hbm %s2430_s0, 512 }
  0x6c   : > { %p1829_p0 = scmp.ne.s32.totalorder %s2174_s18, %s1828_s15  ;;  %p1830_p3 = pneg %p2180_p10 }
  0x6d   : > { %p1834_p9 = scmp.lt.u32.totalorder %s2174_s18, %s2430_s0  ;;  %p1835_p12 = scmp.lt.u32.totalorder %s1833_s28, %s1828_s15 }
  0x6e   : > { %p1831_p5 = pnand %p1830_p3, %p1829_p0  ;;  %p1837_p13 = scmp.lt.u32.totalorder %s1828_s15, %s2174_s18 }
  0x6f   : > { %p1836_p11 = por %p1835_p12, %p1834_p9 }
  0x70   : > { %p1832_p7 = pneg %p1831_p5 }
  0x71   : > { %p1838_p1 = por %p1837_p13, %p1836_p11 }
  0x73   : > { %p1839_p4 = pnand %p1838_p1, %p1832_p7 }
  0x75   : > { %1842 = shalt.err (!%p1839_p4)
}
  0x76   : > { %s1843_s30 = scalar_lea.vmem %s2176_s23, 128  ;;  %s1955_s27 = smov [#allocation3]  }
  0x77   : > { %p1844_p6 = scmp.ne.s32.totalorder %s2176_s23, %s1843_s30  ;;  %s1848_s29 = sshll.u32 %s1955_s27, 4  ;;  %s1849_s29 = int_to_ptr.vmem [resolvable:$false] %s1848_s29 }
  0x78   : > { %s1850_s2 = scalar_lea.vmem %s1849_s29, 256  ;;  %p1851_p5 = scmp.lt.s32.totalorder %s2176_s23, %s1849_s29 }
  0x79   : > { %p1846_p8 = pnand %p1844_p6, %p1830_p3  ;;  %p1852_p9 = scmp.lt.s32.totalorder %s1850_s2, %s1843_s30 }
  0x7b   : > { %p1847_p0 = pneg %p1846_p8  ;;  %p1853_p12 = por %p1852_p9, %p1851_p5 }
  0x7d   : > { %p1854_p11 = pnand %p1853_p12, %p1847_p0 }
  0x7f   : > { %1857 = shalt.err (!%p1854_p11)
}
  0x80   : > { %1653 = dma.hbm_to_vmem [thread:$0]  (!%p2180_p10), %s2174_s18, 128, %s2176_s23, %s345_s25  }
  0x81   : > { %p2463_p7 = scmp.ne.s32.totalorder %s2456_s21, 0 }
  0x82   : > { %s2212_s15 = sand.u32 (!%p2463_p7), 1, %s1932_s10   ;;  %p2464_p3 = scmp.ne.s32.totalorder (!%p2463_p7), %s2453_s19, 0 }
  0x83   : > { %375 = sbr.rel (%p2463_p7) target bundleno = 1714 (0x6b2), region = 56  ;;  %s1411_s16 = sshll.u32 (!%p2463_p7), %s2212_s15, 3 }
  0x84   : > { %s378_s28 = scalar_lea.sflag (!%p2463_p7), [#allocation4], %s2212_s15  ;;  %s2216_s9 = scalar_lea.vmem (!%p2463_p7), [#allocation3], %s1411_s16 }
  0x8a   : > { %1911 = dma.done.wait (%p2464_p3), %s378_s28, 128  }
  0x8b   : > { %1913 = vsyncadd (%p2464_p3), %s378_s28, 4294967168  ;;  %p2465_p10 = scmp.ne.s32.totalorder %s2451_s17, 0 }
  0x8d   : > { %1915 = dma.done.wait (%p2465_p10), [#allocation7], 384  }
  0x8e   : > { %1917 = vsyncadd (%p2465_p10), [#allocation7], 4294966912 }
  0x8f   : > { %1919 = dma.done.wait (%p2465_p10), [#allocation10], 1536  }
  0x90   : > { %1921 = vsyncadd (%p2465_p10), [#allocation10], 4294965760  ;;  %p435_p13 = scmp.lt.s32.totalorder %s1940_s12, 3  ;;  %s2237_s25 = scalar_lea.vmem [#allocation11], %s1411_s16 }
  0x91   : > { %p1417_p1 = scmp.ne.s32.totalorder %s1940_s12, 0 }
  0x92   : > { %s436_s21 = scalar_select %p435_p13, %s1940_s12, 3 }
  0x93   : > { %445 = sbr.rel (%p1417_p1) target bundleno = 154 (0x9a), region = 76  ;;  %v446_v0 = vld [vmem:[#allocation6] sm:$0xff] (!%p1417_p1)  ;;  %vm447_vm0 = vcmask (!%p1417_p1), 261120  }
  0x94   : > { %s1416_s18 = sshll.u32 %s436_s21, 3  ;;  %448 = vst.msk [vmem:[#allocation2] sm:$0xff] (!%p1417_p1), %vm447_vm0, %v446_v0 }
  0x95   : > { %s2235_s20 = scalar_lea.vmem %s2431_s1, %s1416_s18 }
  0x9a PF: > { %v453_v1 = vld [vmem:[#allocation8] sm:$0xff]  ;;  %v454_v2 = vld [vmem:[#allocation8 + $0x8] sm:$0xff]  ;;  %v1956_v3 = vmov 0.0|0.0   ;;  %vm1957_vm1 = vmmov 0   ;;  %v1958_v5 = vmov 0.0   ;;  %vm459_vm2 = vcmask 130048  }
  0x9b   : > { %1571 = vmatprep.subr.bf16.mxu0 %v1956_v3  ;;  %v1572_v4 = vpack.c.bf16 %v454_v2, %v453_v1  ;;  %1486 = vmatprep.mubr.msk.f32.mxu0 %vm1957_vm1, %v1958_v5  ;;  %v534_v6 = vld [vmem:[%s2434_s4] sm:$0xff]  ;;  %v535_v7 = vld [vmem:[%s2434_s4 + $0x8] sm:$0xff]  ;;  %v536_v13 = vld [vmem:[%s2434_s4 + $0x10] sm:$0xff]  ;;  %v455_v19 = vlaneseq  ;;  %vm542_vm3 = vcmask 261120   ;;  %vm1115_vm4 = vcmask 64512   ;;  %s2466_s23 = sld [smem:[#allocation19_spill]] }
  0x9c   : > { %v1420_v8 = vld [vmem:[%s2434_s4 + $0x20] sm:$0xff]  ;;  %1574 = vmatprep.subr.bf16.mxu1 %v1956_v3  ;;  %v1575_v9 = vpack.c.bf16 %v535_v7, %v534_v6  ;;  %v1421_v10 = vld [vmem:[%s2434_s4 + $0x28] sm:$0xff]  ;;  %1497 = vmatprep.mubr.msk.f32.mxu1 %vm1957_vm1, %v1958_v5  ;;  %v537_v14 = vld [vmem:[%s2434_s4 + $0x18] sm:$0xff]  ;;  %vm1239_vm7 = vcmask 7168   ;;  %s1962_s19 = smov 8   ;;  %vm1241_vm9 = vcmask 15368  }
  0x9d   : > { %1573 = vmatpush3.bf16.msra.mxu0 %v1572_v4  ;;  %v449_v11 = vld [vmem:[%s2216_s9] sm:$0xff]  ;;  %v1581_v12 = vpack.c.bf16 %v1421_v10, %v1420_v8  ;;  %v1578_v15 = vpack.c.bf16 %v537_v14, %v536_v13  ;;  %v1423_v17 = vld [vmem:[%s2434_s4 + $0x38] sm:$0xff]  ;;  %v2279_v20 = vshrl.u32 %v455_v19, 7  ;;  %v2285_v22 = vld [vmem:[%s2437_s7] sm:$0xff]  ;;  %s1961_s9 = smov 122   ;;  %vm1247_vm10 = vcmask 23568  }
  0x9e   : > { %1576 = vmatpush3.bf16.msra.mxu1 %v1575_v9  ;;  %1580 = vmatprep.subr.bf16.mxu0 %v1956_v3  ;;  %v1422_v16 = vld [vmem:[%s2434_s4 + $0x30] sm:$0xff]  ;;  %v1425_v24 = vld [vmem:[%s2434_s4 + $0x40] sm:$0xff]  ;;  %v1426_v25 = vld [vmem:[%s2434_s4 + $0x48] sm:$0xff]  ;;  %s1439_s17 = sshll.u32 %s1940_s12, 7  ;;  %s1275_s22 = sshll.u32 %s2237_s25, 4  ;;  %vm1253_vm11 = vcmask 130112   ;;  %s2382_s22 = int_to_ptr.vmem [resolvable:$true] %s1275_s22 }
  0x9f   : > { %1577 = vmatprep.subr.bf16.mxu1 %v1956_v3  ;;  %v1584_v18 = vpack.c.bf16 %v1423_v17, %v1422_v16  ;;  %v457_v21 = vsub.s32 0, %v2279_v20  ;;  %v856_v26 = vld [vmem:[#allocation9 + $0x20] sm:$0xff]  ;;  %v857_v27 = vld [vmem:[#allocation9 + $0x28] sm:$0xff]  ;;  %v1587_v31 = vpack.c.bf16 %v1426_v25, %v1425_v24  ;;  %v858_v36 = vld [vmem:[#allocation9 + $0x30] sm:$0xff]  ;;  %v540_v59 = vsub.s32 1, %v2279_v20  ;;  %s2467_s29 = sld [smem:[#allocation20_spill]] }
  0xa0   : > { %1487 = vmatmul.mubr.msk.f32.vlgmr.msra.gmra.mrb[0].mxu0 %vm459_vm2, %v449_v11  ;;  %v1599_v32 = vpack.c.bf16 %v857_v27, %v856_v26  ;;  %v1427_v33 = vld [vmem:[%s2434_s4 + $0x50] sm:$0xff]  ;;  %v1428_v35 = vld [vmem:[%s2434_s4 + $0x58] sm:$0xff]  ;;  %v859_v37 = vld [vmem:[#allocation9 + $0x38] sm:$0xff]  ;;  %v780_v60 = vsub.s32 4, %v2279_v20  ;;  %v623_v62 = vsub.s32 2, %v2279_v20  ;;  %v862_v63 = vsub.s32 5, %v2279_v20 }
  0xa1   : > { %1582 = vmatpush3.bf16.msra.mxu0 %v1581_v12  ;;  %1508 = vmatprep.mubr.msk.f32.mxu0 %vm1957_vm1, %v1958_v5  ;;  %v458_v23 = vrot.slane %v2285_v22, %v457_v21  ;;  %v1590_v38 = vpack.c.bf16 %v1428_v35, %v1427_v33  ;;  %v1602_v39 = vpack.c.bf16 %v859_v37, %v858_v36  ;;  %v774_v40 = vld [vmem:[#allocation9] sm:$0xff]  ;;  %v775_v41 = vld [vmem:[#allocation9 + $0x8] sm:$0xff]  ;;  %v2308_v45 = vld [vmem:[#allocation2] sm:$0xff]  ;;  %v702_v24 = vsub.s32 3, %v2279_v20  ;;  %s1261_s16 = scalar_lea.sflag [#allocation5], %s2212_s15  ;;  %s1858_s12 = scalar_lea.vmem %s2382_s22, 128 }
  0xa2   : > { %1583 = vmatprep.subr.bf16.mxu0 %v1956_v3  ;;  %1579 = vmatpush3.bf16.msra.mxu1 %v1578_v15  ;;  %v935_v42 = vld [vmem:[#allocation9 + $0x40] sm:$0xff]  ;;  %v936_v43 = vld [vmem:[#allocation9 + $0x48] sm:$0xff]  ;;  %v1593_v44 = vpack.c.bf16 %v775_v41, %v774_v40  ;;  %v776_v46 = vld [vmem:[#allocation9 + $0x10] sm:$0xff]  ;;  %v541_v4 = vrot.slane %v2285_v22, %v540_v59  ;;  %v781_v6 = vrot.slane %v2285_v22, %v780_v60  ;;  %v1040_v40 = vsub.s32 7, %v2279_v20  ;;  %p1859_p4 = scmp.ne.s32.totalorder %s2382_s22, %s1858_s12  ;;  %s1963_s28 = smov [#allocation11]  }
  0xa3   : > { %1586 = vmatprep.subr.bf16.mxu1 %v1956_v3  ;;  %v777_v47 = vld [vmem:[#allocation9 + $0x18] sm:$0xff]  ;;  %v1605_v48 = vpack.c.bf16 %v936_v43, %v935_v42  ;;  %v937_v49 = vld [vmem:[#allocation9 + $0x50] sm:$0xff]  ;;  %v1036_v55 = vld [vmem:[%s2436_s6 + $0x10] sm:$0xff]  ;;  %v624_v7 = vrot.slane %v2285_v22, %v623_v62  ;;  %v703_v27 = vrot.slane %v2285_v22, %v702_v24  ;;  %vm1258_vm12 = vcmask 392320   ;;  %s1862_s21 = sshll.u32 %s1963_s28, 4  ;;  %s1863_s21 = int_to_ptr.vmem [resolvable:$false] %s1862_s21 }
  0xa4   : > { %v938_v50 = vld [vmem:[#allocation9 + $0x58] sm:$0xff]  ;;  %v1596_v51 = vpack.c.bf16 %v777_v47, %v776_v46  ;;  %v1034_v53 = vld [vmem:[%s2436_s6] sm:$0xff]  ;;  %v1037_v57 = vld [vmem:[%s2436_s6 + $0x18] sm:$0xff]  ;;  %v1616_v8 = vadd.f32 %v781_v6, %v541_v4  ;;  %v1041_v41 = vrot.slane %v2285_v22, %v1040_v40  ;;  %p1860_p6 = pnand %p1859_p4, %p2157_p2  ;;  %s1864_s18 = scalar_lea.vmem %s1863_s21, 256 }
  0xa5   : > { %1585 = vmatpush3.bf16.msra.mxu0 %v1584_v18  ;;  %v1608_v52 = vpack.c.bf16 %v938_v50, %v937_v49  ;;  %v1035_v54 = vld [vmem:[%s2436_s6 + $0x8] sm:$0xff]  ;;  %v1614_v58 = vpack.c.bf16 %v1037_v57, %v1036_v55  ;;  %s2380_s2 = scalar_lea.hbm %s2467_s29, %s1439_s17  ;;  %p1865_p0 = scmp.lt.s32.totalorder %s2382_s22, %s1863_s21 }
  0xa6   : > { %1598 = vmatprep.subr.bf16.mxu0 %v1956_v3  ;;  %v1611_v56 = vpack.c.bf16 %v1035_v54, %v1034_v53  ;;  %p1861_p8 = pneg %p1860_p6  ;;  %p1866_p5 = scmp.lt.s32.totalorder %s1864_s18, %s1858_s12 }
  0xa8   : > { %p1867_p9 = por %p1866_p5, %p1865_p0 }
  0xaa   : > { %p1868_p12 = pnand %p1867_p9, %p1861_p8 }
 0x173   : > { %v529_v28 = vpop.f32.mrb[0].mxu0 }
 0x174   : > { %v530_v29 = vadd.f32 %v529_v28, %v458_v23  ;;  %v1488_v30 = vpop.f32.mrb[1].mxu0  ;;  %v941_v23 = vsub.s32 6, %v2279_v20  ;;  %v1130_v20 = vld [vmem:[%s2466_s23] sm:$0xff] }
 0x176   : > { %v533_v34 = vmax.f32 %v530_v29, 0.0  ;;  %v942_v25 = vrot.slane %v2285_v22, %v941_v23 }
 0x178   : > { %1498 = vmatmul.mubr.msk.f32.vlgmr.msra.gmra.mrb[0].mxu1 %vm542_vm3, %v533_v34  ;;  %1509 = vmatmul.mubr.msk.f32.vlgmr.msra.gmra.mrb[2].mxu0 %vm542_vm3, %v533_v34 }
 0x179   : > { %1588 = vmatpush3.bf16.msra.mxu1 %v1587_v31  ;;  %1600 = vmatpush3.bf16.msra.mxu0 %v1599_v32 }
 0x17a   : > { %1589 = vmatprep.subr.bf16.mxu1 %v1956_v3  ;;  %1601 = vmatprep.subr.bf16.mxu0 %v1956_v3 }
 0x17b   : > { %1519 = vmatprep.mubr.msk.f32.mxu1 %vm1957_vm1, %v1958_v5  ;;  %1541 = vmatprep.mubr.msk.f32.mxu0 %vm1957_vm1, %v1958_v5 }
 0x17d   : > { %1591 = vmatpush3.bf16.msra.mxu1 %v1590_v38  ;;  %1603 = vmatpush3.bf16.msra.mxu0 %v1602_v39 }
 0x17e   : > { %1592 = vmatprep.subr.bf16.mxu1 %v1956_v3  ;;  %1604 = vmatprep.subr.bf16.mxu0 %v1956_v3 }
 0x180   : > { %1520 = vmatmul.mubr.msk.f32.vlgmr.msra.gmra.mrb[2].mxu1 %vm542_vm3, %v533_v34  ;;  %1542 = vmatmul.mubr.msk.f32.vlgmr.msra.gmra.mrb[2].mxu0 %vm542_vm3, %v2308_v45 }
 0x181   : > { %1594 = vmatpush3.bf16.msra.mxu1 %v1593_v44  ;;  %1530 = vmatprep.mubr.msk.f32.mxu1 %vm1957_vm1, %v1958_v5 }
 0x182   : > { %1595 = vmatprep.subr.bf16.mxu1 %v1956_v3  ;;  %1606 = vmatpush3.bf16.msra.mxu0 %v1605_v48 }
 0x183   : > { %1607 = vmatprep.subr.bf16.mxu0 %v1956_v3  ;;  %1552 = vmatprep.mubr.msk.f32.mxu0 %vm1957_vm1, %v1958_v5 }
 0x185   : > { %1597 = vmatpush3.bf16.msra.mxu1 %v1596_v51  ;;  %v1959_v51 = vmov 0  }
 0x186   : > { %1609 = vmatpush3.bf16.msra.mxu0 %v1608_v52  ;;  %1610 = vmatprep.subr.bf16.mxu1 %v1956_v3 }
 0x187   : > { %1566 = vmatprep.subr.mxu0 %v1958_v5  ;;  %1726 = vset.pattern.permute.xlu1 %v1959_v51 }
 0x188   : > { %1531 = vmatmul.mubr.msk.f32.vlgmr.msra.gmra.mrb[0].mxu1 %vm542_vm3, %v2308_v45  ;;  %1727 = vset.pattern.permute.xlu0 %v1959_v51 }
 0x189   : > { %1553 = vmatmul.mubr.msk.f32.vlgmr.msra.gmra.mrb[4].mxu0 %vm542_vm3, %v2308_v45  ;;  %1563 = vmatprep.mubr.msk.f32.mxu1 %vm1957_vm1, %v1958_v5 }
 0x18a   : > { %1568 = vmatprep.mubr.msk.f32.mxu0 %vm1957_vm1, %v1958_v5  ;;  %1612 = vmatpush3.bf16.msra.mxu1 %v1611_v56 }
 0x18b   : > { %1613 = vmatprep.subr.bf16.mxu1 %v1956_v3  ;;  %v863_v3 = vrot.slane %v2285_v22, %v862_v63  ;;  %1567 = vmatpush3.msra.mxu0 %v1130_v20  ;;  %v450_v22 = vld [vmem:[%s2235_s20] sm:$0xff]  ;;  %s1960_s20 = smov 16  }
 0x18c   : > { %1206 = vperm.xlu1 %1726, %v450_v22  }
 0x18d   : > { %v1618_v9 = vadd.f32 %v863_v3, %v624_v7 }
 0x18e   : > { %1615 = vmatpush3.bf16.msra.mxu1 %v1614_v58 }
 0x20b   : > { %v1207_v55 = vpop.permute.xlu1 %1206 }
 0x253   : > { %v770_v61 = vpop.f32.mrb[2].mxu1  ;;  %v930_v0 = vpop.f32.mrb[2].mxu0 }
 0x254   : > { %v1521_v1 = vpop.f32.mrb[3].mxu1  ;;  %v1543_v2 = vpop.f32.mrb[3].mxu0  ;;  %v1619_v16 = vadd.f32 %v1618_v9, %v930_v0  ;;  %v771_v31 = vadd.f32 %v770_v61, %v703_v27  ;;  %v1227_v9 = vand.u32 127, %v455_v19 }
 0x256   : > { %v1434_v17 = vmul.f32 -1.442695, %v1619_v16 }
 0x25b   : > { %v851_v10 = vpop.f32.mrb[0].mxu1 }
 0x25c   : > { %v1617_v11 = vadd.f32 %v1616_v8, %v851_v10  ;;  %v1532_v12 = vpop.f32.mrb[1].mxu1  ;;  %v1009_v13 = vpop.f32.mrb[4].mxu0 }
 0x25d   : > { %v1554_v14 = vpop.f32.mrb[5].mxu0  ;;  %v1010_v29 = vadd.f32 %v1009_v13, %v942_v25 }
 0x25e   : > { %v1433_v15 = vmul.f32 -1.442695, %v1617_v11 }
 0x260   : > { %1728 = vpow2.f32 %v1433_v15 }
 0x261   : > { %1730 = vpow2.f32 %v1434_v17 }
 0x26a   : > { %v1729_v18 = vpop.eup %1728 }
 0x26b   : > { %v1017_v21 = vadd.f32 1.0, %v1729_v18  ;;  %v1731_v26 = vpop.eup %1730 }
 0x26c   : > { %v1024_v28 = vadd.f32 1.0, %v1731_v26 }
 0x26d   : > { %1732 = vrcp.f32 %v1017_v21 }
 0x26e   : > { %1734 = vrcp.f32 %v1024_v28 }
 0x277   : > { %v1733_v30 = vpop.eup %1732 }
 0x278   : > { %v1027_v32 = vmul.f32 %v1733_v30, %v1010_v29  ;;  %v1735_v34 = vpop.eup %1734 }
 0x279   : > { %v1030_v35 = vsub.f32 1.0, %v1735_v34  ;;  %v1032_v38 = vmul.f32 %v1735_v34, %v2308_v45 }
 0x27a   : > { %v1028_v33 = vadd.f32 %v1027_v32, %v771_v31 }
 0x27c   : > { %1736 = vtanh.f32 %v1028_v33 }
 0x286   : > { %v1737_v36 = vpop.eup %1736 }
 0x287   : > { %v1031_v37 = vmul.f32 %v1737_v36, %v1030_v35 }
 0x289   : > { %v1033_v39 = vadd.f32 %v1032_v38, %v1031_v37 }
 0x28b   : > { %1564 = vmatmul.mubr.msk.f32.vlgmr.msra.gmra.mrb[4].mxu1 %vm542_vm3, %v1033_v39  ;;  %1237 = vst.msk [vmem:[#allocation2] sm:$0xff] %vm542_vm3, %v1033_v39 }
 0x35e   : > { %v1111_v42 = vpop.f32.mrb[4].mxu1 }
 0x35f   : > { %v1112_v43 = vadd.f32 %v1111_v42, %v1041_v41  ;;  %v1565_v44 = vpop.f32.mrb[5].mxu1 }
 0x361   : > { %v1116_v46 = vsel %vm1115_vm4, %v1112_v43, -inf }
 0x362   : > { %1117 = vmax.xlane.f32.xlu0 %v1116_v46 }
 0x3ef   : > { %v1118_v47 = vpop.xlane.xlu0 %1117 }
 0x3f0   : > { %v1119_v48 = vsub.f32 %v1112_v43, %v1118_v47 }
 0x3f2   : > { %v1120_v45 = vmul.f32 1.442695, %v1119_v48 }
 0x3f4   : > { %1738 = vpow2.f32 %v1120_v45 }
 0x3fe   : > { %v1739_v49 = vpop.eup %1738 }
 0x3ff   : > { %v1122_v50 = vsel %vm1115_vm4, %v1739_v49, 0.0 }
 0x400   : > { %1123 = vadd.xlane.f32.xlu0 %v1122_v50 }
 0x48d   : > { %v1124_v52 = vpop.xlane.xlu0 %1123 }
 0x48e   : > { %1740 = vrcp.f32 %v1124_v52 }
 0x48f   : > { %1742 = vlog2.f32 %v1124_v52 }
 0x498   : > { %v1741_v53 = vpop.eup %1740 }
 0x499   : > { %v1126_v54 = vmul.f32 %v1741_v53, %v1739_v49  ;;  %v1743_v4 = vpop.eup %1742 }
 0x49a   : > { %v1128_v3 = vmul.f32 0.6931472, %v1743_v4 }
 0x49b   : > { %1569 = vmatmul.mubr.msk.f32.vlgmr.msra.gmra.mrb[6].mxu0 %vm1115_vm4, %v1126_v54  ;;  %v1235_v16 = vsub.f32 0.0, %v1126_v54 }
 0x49c   : > { %v1129_v12 = vsub.f32 %v1119_v48, %v1128_v3 }
 0x49e   : > { %v1236_v17 = vmul.f32 %v1235_v16, %v1129_v12 }
 0x56e   : > { %v1200_v56 = vpop.f32.mrb[6].mxu0 }
 0x56f   : > { %vm1209_vm5 = vcmp.lt.f32.partialorder %v1200_v56, %v1207_v55  ;;  %v1570_v57 = vpop.f32.mrb[7].mxu0 }
 0x570   : > { %v1210_v58 = vsel %vm1209_vm5, 1, %v1959_v51 }
 0x571   : > { %v1211_v59 = vsel %vm1115_vm4, %v1210_v58, 0 }
 0x572   : > { %v1213_v60 = vshrl.u32 %v1211_v59, 16  ;;  %v1212_v61 = vand.u32 65535, %v1211_v59 }
 0x574   : > { %v1215_v62 = vcvt.s32.f32 %v1213_v60  ;;  %v1214_v63 = vcvt.s32.f32 %v1212_v61 }
 0x576   : > { %1218 = vadd.xlane.f32.xlu1 %v1215_v62  ;;  %1216 = vadd.xlane.f32.xlu0 %v1214_v63 }
 0x587   : > { %1255 = vrot.lane.b32.xlu1 %v1033_v39, %s1960_s20 }
 0x58c   : > { %1244 = vrot.lane.b32.xlu0 %v1112_v43, %s1961_s9 }
 0x603   : > { %v1219_v0 = vpop.xlane.xlu1 %1218  ;;  %v1217_v1 = vpop.xlane.xlu0 %1216 }
 0x604   : > { %v1221_v2 = vcvt.f32.s32 %v1219_v0  ;;  %v1220_v7 = vcvt.f32.s32 %v1217_v1 }
 0x606   : > { %v1222_v6 = vshll.u32 %v1221_v2, 16 }
 0x607   : > { %v1245_v19 = vpop.permute.xlu0 %1244  ;;  %v1256_v21 = vpop.permute.xlu1 %1255 }
 0x608   : > { %v1223_v8 = vadd.s32 %v1222_v6, %v1220_v7 }
 0x60a   : > { %vm1224_vm6 = vcmp.lt.s32.totalorder %v1223_v8, 7 }
 0x60b   : > { %v1225_v10 = vsel %vm1224_vm6, %v1223_v8, 7 }
 0x60c   : > { %v1238_v11 = vcvt.s32.f32 %v1225_v10  ;;  %vm1228_vm8 = vcmp.eq.s32.totalorder %v1227_v9, %v1225_v10 }
 0x60d   : > { %v1437_v13 = vsel %vm1228_vm8, 1.0, %v1958_v5 }
 0x60e   : > { %v1231_v14 = vmul.f32 %v1437_v13, %v1129_v12  ;;  %1240 = vst.msk [vmem:[%s2237_s25] sm:$0xff] %vm1239_vm7, %v1238_v11 }
 0x610   : > { %v1232_v15 = vsel %vm1115_vm4, %v1231_v14, 0.0 }
 0x611   : > { %1233 = vadd.xlane.f32.xlu0 %v1232_v15 }
 0x627   : > { %1250 = vrot.lane.b32.xlu0 %v1236_v17, %s1962_s19 }
 0x69e   : > { %v1234_v18 = vpop.xlane.xlu0 %1233 }
 0x69f   : > { %1242 = vst.msk [vmem:[%s2237_s25] sm:$0xff] %vm1241_vm9, %v1234_v18 }
 0x6a0   : > { %1248 = vst.msk [vmem:[%s2237_s25] sm:$0xff] %vm1247_vm10, %v1245_v19 }
 0x6a2   : > { %v1251_v5 = vpop.permute.xlu0 %1250 }
 0x6a3   : > { %1254 = vst.msk [vmem:[%s2237_s25] sm:$0xff] %vm1253_vm11, %v1251_v5 }
 0x6a4   : > { %1259 = vst.msk [vmem:[%s2237_s25] sm:$0xff] %vm1258_vm12, %v1256_v21 }
 0x6a5   : > { %1871 = shalt.err (!%p1868_p12)
}
 0x6a6   : > { %s1872_s15 = scalar_lea.hbm %s2380_s2, 128  ;;  %s1876_s20 = scalar_lea.hbm %s2467_s29, 512 }
 0x6a7   : > { %p1873_p11 = scmp.ne.s32.totalorder %s2380_s2, %s1872_s15  ;;  %p1877_p10 = scmp.lt.u32.totalorder %s2380_s2, %s2467_s29 }
 0x6a8   : > { %p1878_p13 = scmp.lt.u32.totalorder %s1876_s20, %s1872_s15  ;;  %p1880_p4 = scmp.lt.u32.totalorder %s1872_s15, %s2380_s2 }
 0x6a9   : > { %p1874_p7 = pnand %p1873_p11, %p2157_p2 }
 0x6aa   : > { %p1879_p1 = por %p1878_p13, %p1877_p10 }
 0x6ab   : > { %p1875_p3 = pneg %p1874_p7 }
 0x6ac   : > { %p1881_p6 = por %p1880_p4, %p1879_p1 }
 0x6ae   : > { %p1882_p8 = pnand %p1881_p6, %p1875_p3 }
 0x6b0   : > { %1885 = shalt.err (!%p1882_p8)
}
 0x6b1   : > { %1638 = dma.vmem_to_hbm [thread:$0]  (%p2157_p2), %s2382_s22, 128, %s2380_s2, %s1261_s16  }
 0x6b2 PF: > { %s2468_s17 = sld [smem:[#allocation16_spill]]  ;;  %s2469_s30 = sld [smem:[#allocation17_spill]] }
 0x6b3   : > { %p1665_p0 = scmp.ge.s32.totalorder %s1948_s14, 2 }
 0x6b8   : > { %s1287_s27 = sand.u32 1, %s2468_s17   ;;  %p2470_p5 = scmp.ne.s32.totalorder %s2469_s30, 0 }
 0x6b9   : > { %s1288_s12 = scalar_lea.sflag [#allocation5], %s1287_s27 }
 0x6ba   : > { %p1655_p9 = pnand %p1665_p0, %p2470_p5 }
 0x6bc   : > { %1923 = dma.done.wait (!%p1655_p9), %s1288_s12, 128  }
 0x6bd   : > { %1925 = vsyncadd (!%p1655_p9), %s1288_s12, 4294967168  ;;  %s27_s14 = sadd.s32 1, %s1948_s14   ;;  %s2471_s30 = smov %s1932_s10 }
 0x6be   : > { %p24_p12 = scmp.ge.s32.totalorder %s27_s14, 6   ;;  %s2472_s10 = smov %s1936_s11 }
 0x6bf   : > { %s2473_s11 = smov %s2169_s8  ;;  %s2474_s12 = smov %s1944_s13 }
 0x6c0   : > { %s2475_s13 = smov %s2477_s24  ;;  %26 = sbr.rel (!%p24_p12) target bundleno = 12 (0xc), region = 125 }
 0x6c7   :  { %1293 = vsyncpa [#allocation4], 1 }
 0x6c8   :  { %1295 = vsyncpa [#allocation4 + $0x1], 1 }
 0x6c9   :  { %1296 = vsyncpa [#allocation7], 1 }
 0x6ca   :  { %1297 = vsyncpa [#allocation10], 1 }
 0x6cb   :  { %1298 = vsyncpa [#allocation5], 1 }
 0x6cc   :  { %1300 = vsyncpa [#allocation5 + $0x1], 1 }

</bundles_post_ra>
